<compile_context>
chip_gen: v6e
topology: v6e:2x2x1
jax: 0.10.0
libtpu: 0.0.40
codegen_flags: <defaults>
</compile_context>

<pallas_src>
import functools

import jax
import jax.numpy as jnp
from jax.experimental import pallas as pl
from jax.experimental.pallas import tpu as pltpu


def _relu2_kernel(x_ref, o_ref):
    x = x_ref[...]
    r = jnp.maximum(x, jnp.zeros_like(x))
    o_ref[...] = r * r


_LANE_CANDIDATES = (2048, 1024, 512, 256, 128)
_BLOCK_BYTES_DEFAULT = 4 * 1024 * 1024   # v5e / v6e: past the tile-size knee
_BLOCK_BYTES_V7X = 8 * 1024 * 1024       # v7x: faster HBM, keep steps >= ~5 us
_VMEM_SLACK_BYTES = 8 * 1024 * 1024


def _round_up(a, m):
    return -(-a // m) * m


@functools.lru_cache(maxsize=1)
def _tpu_generation():
    """Best-effort chip-generation tag: 'v7', 'v6', 'v5', or '' (unknown)."""
    try:
        kind = jax.devices()[0].device_kind.lower()
    except Exception:
        return ""
    for gen in ("v7", "v6", "v5"):
        if gen in kind:
            return gen
    return ""


def relu2(x: jax.Array) -> jax.Array:
    """Elementwise relu(x)**2. Preserves shape & dtype."""
    orig_shape = x.shape
    dtype = x.dtype
    total = int(x.size)

    def _fallback():
        # Fused XLA elementwise op: reads/writes exactly N bytes at roofline.
        r = jnp.maximum(x, jnp.zeros_like(x))
        return r * r

    # Non-float dtypes: squaring in the narrow dtype wraps; keep jnp semantics.
    if total == 0 or not jnp.issubdtype(dtype, jnp.floating):
        return _fallback()

    itemsize = jnp.dtype(dtype).itemsize
    sub = max(8, 32 // itemsize)  # sublane multiple: 8 (f32), 16 (bf16)

    # Widest lane width (multiple of 128) that divides the element count exactly
    # AND leaves at least one full sublane group of rows -> zero padding needed.
    lane = None
    for cand in _LANE_CANDIDATES:
        if total % cand == 0 and total // cand >= sub:
            lane = cand
            break
    if lane is None:
        # Would require pad + slice (1-2 extra full HBM passes) or is tiny:
        # the fused jnp path wins outright.
        return _fallback()

    rows = total // lane  # exact

    gen = _tpu_generation()
    if gen == "v7":
        target_block_bytes = _BLOCK_BYTES_V7X
    else:
        target_block_bytes = _BLOCK_BYTES_DEFAULT

    row_bytes = lane * itemsize
    tm_cap = max(sub, (target_block_bytes // row_bytes) // sub * sub)

    if gen == "v7":
        # Even count of near-equal row tiles so both TensorCores get balanced
        # work; each tile stays ~<= tm_cap (~8 MiB).
        k = max(1, -(-rows // (2 * tm_cap)))          # ceil(rows / (2*tm_cap))
        tm = _round_up(-(-rows // (2 * k)), sub)      # ceil(rows/(2k)) -> sublane mult.
    else:
        # Single TensorCore: extra grid steps are pure serial overhead.
        tm = tm_cap
    tm = min(tm, _round_up(rows, sub))
    tm = max(tm, sub)

    grid_m = pl.cdiv(rows, tm)  # ragged last block handled by Pallas masking

    block_bytes = tm * lane * itemsize
    # 2 double-buffers x (in + out) x block + slack; leaves headroom for
    # neighboring XLA fusions (important on v7x's 64 MiB VMEM).
    vmem_limit = 4 * block_bytes + _VMEM_SLACK_BYTES

    x2 = x.reshape(rows, lane)

    out = pl.pallas_call(
        _relu2_kernel,
        out_shape=jax.ShapeDtypeStruct((rows, lane), dtype),
        grid_spec=pltpu.PrefetchScalarGridSpec(
            num_scalar_prefetch=0,
            grid=(grid_m,),
            in_specs=[pl.BlockSpec((tm, lane), lambda i: (i, 0))],
            out_specs=pl.BlockSpec((tm, lane), lambda i: (i, 0)),
        ),
        compiler_params=pltpu.CompilerParams(
            dimension_semantics=("parallel",),
            vmem_limit_bytes=vmem_limit,
        ),
        cost_estimate=pl.CostEstimate(
            flops=2 * total,
            transcendentals=0,
            bytes_accessed=2 * total * itemsize,
        ),
    )(x2)

    return out.reshape(orig_shape)


if __name__ == "__main__":
    key = jax.random.PRNGKey(0)
    k0, k1, k2 = jax.random.split(key, 3)

    # Small NCHW activation map (typical module input) -> pad-free Pallas path.
    x = jax.random.normal(k0, (2, 4, 16, 16), dtype=jnp.float32)
    y = jax.block_until_ready(relu2(x))
    y_ref = jnp.maximum(x, 0.0) ** 2
    assert y.shape == x.shape and y.dtype == x.dtype
    assert jnp.allclose(y, y_ref, atol=0.0, rtol=0.0), "mismatch vs reference"

    # Larger tensor whose row count is not a multiple of the row tile ->
    # exercises the masked (ragged) grid block, still with zero padding.
    x_big = jax.random.normal(k1, (8, 3, 100, 128), dtype=jnp.float32)
    y_big = jax.block_until_ready(relu2(x_big))
    y_big_ref = jnp.maximum(x_big, 0.0) ** 2
    assert y_big.shape == x_big.shape and y_big.dtype == x_big.dtype
    assert jnp.allclose(y_big, y_big_ref, atol=0.0, rtol=0.0), "mismatch (ragged)"

    # Odd shape with no 128-multiple divisor -> fused jnp fallback (no pad/slice).
    x_odd = jax.random.normal(k2, (3, 5, 7), dtype=jnp.float32)
    y_odd = jax.block_until_ready(relu2(x_odd))
    y_odd_ref = jnp.maximum(x_odd, 0.0) ** 2
    assert y_odd.shape == x_odd.shape and y_odd.dtype == x_odd.dtype
    assert jnp.allclose(y_odd, y_odd_ref, atol=0.0, rtol=0.0), "mismatch (odd shape)"

    print("KERNEL_OK")
</pallas_src>

<mosaic_0001>
module attributes {stable_mosaic.version = 11 : i64} {
  func.func @_relu2_kernel(%arg0: i32, %arg1: memref<8x256xf32, #tpu.memory_space<vmem>>, %arg2: memref<8x256xf32, #tpu.memory_space<vmem>>) attributes {dimension_semantics = [#tpu.dimension_semantics<parallel>], iteration_bounds = array<i64: 1>, scalar_prefetch = 0 : i64, scratch_operands = 0 : i64, tpu.core_type = #tpu.core_type<tc>, window_params = [{transform_indices = @transform_0, window_bounds = array<i64: 8, 256>}, {transform_indices = @transform_1, window_bounds = array<i64: 8, 256>}]} {
    %c0 = arith.constant 0 : index
    %c0_0 = arith.constant 0 : index
    %0 = vector.load %arg1[%c0, %c0_0] : memref<8x256xf32, #tpu.memory_space<vmem>>, vector<8x256xf32>
    %cst = arith.constant 0.000000e+00 : f32
    %1 = vector.broadcast %cst : f32 to vector<8x256xf32>
    %2 = arith.maximumf %0, %1 : vector<8x256xf32>
    %3 = arith.mulf %2, %2 : vector<8x256xf32>
    %c0_1 = arith.constant 0 : index
    %c0_2 = arith.constant 0 : index
    %4 = vector.load %arg2[%c0_1, %c0_2] : memref<8x256xf32, #tpu.memory_space<vmem>>, vector<8x256xf32>
    tpu.vector_store %arg2[%c0_1, %c0_2], %3 {strides = array<i32>} : memref<8x256xf32, #tpu.memory_space<vmem>>, vector<8x256xf32>,
    return
  }
  func.func @transform_0(%arg0: i32) -> (i32, i32) {
    %c0_i32 = arith.constant 0 : i32
    %c0_i32_0 = arith.constant 0 : i32
    return %arg0, %c0_i32 : i32, i32
  }
  func.func @transform_1(%arg0: i32) -> (i32, i32) {
    %c0_i32 = arith.constant 0 : i32
    %c0_i32_0 = arith.constant 0 : i32
    return %arg0, %c0_i32 : i32, i32
  }
}

</mosaic_0001>

<bundles_post_ra>
// kernel: tpu_custom_call.1
= control target key start
LH: loop header
LB: loop body
LE: loop exit
PB: predicated region body
PF: predicated region fallthrough
CT: control target
= control target key end

     0   :  { %6 = vsyncpa [#allocation3], 0  ;;  %s108_s0 = inlined_call_operand.hbm [shape: f32[8,256], index: 0, kind: input, shape index: {}]   ;;  %s109_s1 = inlined_call_operand.hbm [shape: f32[8,256], index: 1, kind: output, shape index: {}]  }
   0x1   :  { %7 = vsyncpa [#allocation4], 0  ;;  %s90_s6 = smov [#allocation2]  }
   0x2   :  { %s14_s7 = sshll.u32 %s90_s6, 4  ;;  %s15_s7 = int_to_ptr.vmem [resolvable:$true] %s14_s7 }
   0x3   :  { %s54_s8 = scalar_lea.vmem %s15_s7, 256  ;;  %p59_p1 = scmp.lt.s32.totalorder %s15_s7, %s15_s7 }
   0x4   :  { %p55_p0 = scmp.ne.s32.totalorder %s15_s7, %s54_s8  ;;  %p60_p2 = scmp.lt.s32.totalorder %s54_s8, %s54_s8 }
   0x6   :  { %p61_p3 = por %p60_p2, %p59_p1 }
   0x8   :  { %p62_p4 = pnand %p61_p3, %p55_p0 }
   0xa   :  { %65 = shalt.err (!%p62_p4)
}
   0xb   :  { %17 = dma.hbm_to_vmem [thread:$0]  %s108_s0, 256, %s15_s7, [#allocation3]  }
   0xc   :  { %86 = dma.done.wait [#allocation3], 256  }
   0xd   :  { %87 = vsyncadd [#allocation3], 4294967040  ;;  %v21_v0 = vld [vmem:[#allocation2] sm:$0xff]  ;;  %v22_v1 = vld [vmem:[#allocation2 + $0x8] sm:$0xff]  ;;  %s91_s11 = smov [#allocation5]  }
   0xe   :  { %s35_s12 = sshll.u32 %s91_s11, 4  ;;  %v23_v2 = vmax.f32 %v21_v0, 0.0  ;;  %v24_v3 = vmax.f32 %v22_v1, 0.0  ;;  %s36_s12 = int_to_ptr.vmem [resolvable:$true] %s35_s12 }
   0xf   :  { %s66_s13 = scalar_lea.vmem %s36_s12, 256  ;;  %p71_p6 = scmp.lt.s32.totalorder %s36_s12, %s36_s12 }
  0x10   :  { %v25_v4 = vmul.f32 %v23_v2, %v23_v2  ;;  %v26_v5 = vmul.f32 %v24_v3, %v24_v3  ;;  %p67_p5 = scmp.ne.s32.totalorder %s36_s12, %s66_s13  ;;  %p72_p7 = scmp.lt.s32.totalorder %s66_s13, %s66_s13 }
  0x12   :  { %27 = vst [vmem:[#allocation5] sm:$0xff] %v25_v4  ;;  %28 = vst [vmem:[#allocation5 + $0x8] sm:$0xff] %v26_v5  ;;  %p73_p8 = por %p72_p7, %p71_p6 }
  0x14   :  { %p74_p9 = pnand %p73_p8, %p67_p5 }
  0x16   :  { %77 = shalt.err (!%p74_p9)
}
  0x17   :  { %38 = dma.vmem_to_hbm [thread:$0]  %s36_s12, 256, %s109_s1, [#allocation4]  }
  0x18   :  { %88 = dma.done.wait [#allocation4], 256  }
  0x19   :  { %89 = vsyncadd [#allocation4], 4294967040 }
  0x1a   :  { %42 = vsyncpa [#allocation3], 1 }
  0x1b   :  { %43 = vsyncpa [#allocation4], 1 }

</bundles_post_ra>
